<compile_context>
chip_gen: v5e
topology: v5e:2x2
jax: 0.10.0
libtpu: 0.0.40
codegen_flags: <defaults>
</compile_context>

<pallas_src>
import jax
import jax.numpy as jnp
from jax.experimental import pallas as pl
from jax.experimental.pallas import tpu as pltpu

PERMUTATION = (0, 2, 3, 1)  # NCHW -> NHWC

_LANE = 128
_TILE_BYTES = 4 * 1024 * 1024     # per-tile byte budget (input tile == output tile)
_MIN_GRID_STEPS = 4               # keep >= 2x work per TC for v7x megacore
_MIN_PALLAS_BYTES = 256 * 1024    # below this per-batch slab size, XLA transpose wins


def _cdiv(a, b):
    return -(-a // b)


def _choose_tiles(n, c, hw, itemsize):
    """Dtype-aware tile sizes; no padding — ragged edges handled by Pallas."""
    # Full-channel tile whenever a single 128-lane column of it fits the budget:
    # contiguous output writeback and (usually) no channel grid axis.
    if c * _LANE * itemsize <= _TILE_BYTES:
        tc = c
    else:
        tc = max(_LANE, (_TILE_BYTES // (_LANE * itemsize)) // _LANE * _LANE)

    # Spatial (input-lane) tile: as wide as the budget allows, 128-aligned,
    # or the full extent (always a legal block dim) when it already fits.
    max_thw = max(_LANE, (_TILE_BYTES // (tc * itemsize)) // _LANE * _LANE)
    thw = hw if hw <= max_thw else max_thw

    # v7x has 2 TensorCores sharding the parallel grid axes: make sure there are
    # enough grid steps when the slab is small enough to collapse the grid.
    c_tiles = _cdiv(c, tc)
    while n * _cdiv(hw, thw) * c_tiles < _MIN_GRID_STEPS:
        cand = (thw // 2) // _LANE * _LANE   # halve, keep 128-lane aligned
        if cand < _LANE:
            break
        thw = cand
    return tc, thw


def _permute_tile_kernel(x_ref, o_ref):
    # x_ref: (TC, THW)   o_ref: (THW, TC)   (batch dim squeezed away)
    # out[hw, c] = x[c, hw]  -> XLU transpose on one VMEM tile.
    # TODO(synk): if bundle dumps show the vxpose slot saturating on v7x for
    # bf16/int8, switch to a pltpu.bitcast pack-to-u32 transpose (2x/4x fewer
    # XLU ops) — HBM-bound for f32 today.
    o_ref[...] = x_ref[...].T


def permute_nchw_to_nhwc(x, *, force_kernel=False):
    """Pallas implementation of torch.permute(x, (0, 2, 3, 1)) for NCHW input."""
    n, c, h, w = x.shape
    hw = h * w
    itemsize = jnp.dtype(x.dtype).itemsize
    slab_bytes = c * hw * itemsize

    if not force_kernel and slab_bytes < _MIN_PALLAS_BYTES:
        # Tiny tensors: per-grid-step overhead dominates; XLA's transpose wins.
        return jnp.transpose(x, PERMUTATION)

    tc, thw = _choose_tiles(n, c, hw, itemsize)
    c_tiles = _cdiv(c, tc)
    hw_tiles = _cdiv(hw, thw)
    # Channel tiles innermost: consecutive steps write adjacent column groups of
    # the same output rows (moot when c_tiles == 1, the common case).
    grid = (n, hw_tiles, c_tiles)

    x2 = x.reshape(n, c, hw)  # metadata-only reshape

    tile_bytes = tc * thw * itemsize
    vmem_limit = min(48 * 1024 * 1024,
                     max(32 * 1024 * 1024, 4 * tile_bytes + 4 * 1024 * 1024))

    out2 = pl.pallas_call(
        _permute_tile_kernel,
        out_shape=jax.ShapeDtypeStruct((n, hw, c), x.dtype),
        grid=grid,
        in_specs=[
            pl.BlockSpec(
                (pl.Squeezed(), tc, thw),
                lambda b, hi, ci: (b, ci, hi),
            )
        ],
        out_specs=pl.BlockSpec(
            (pl.Squeezed(), thw, tc),
            lambda b, hi, ci: (b, hi, ci),
        ),
        compiler_params=pltpu.CompilerParams(
            dimension_semantics=("parallel", "parallel", "parallel"),
            vmem_limit_bytes=vmem_limit,
        ),
        cost_estimate=pl.CostEstimate(
            flops=0,
            transcendentals=0,
            bytes_accessed=2 * n * c * hw * itemsize,
        ),
    )(x2)

    return out2.reshape(n, h, w, c)  # metadata-only reshape


def permute(x, permutation):
    """PermuteLayer.forward: Pallas path for NCHW->NHWC, fallback otherwise."""
    permutation = tuple(permutation)
    if permutation == tuple(range(x.ndim)):
        return x
    if x.ndim == 4 and permutation == PERMUTATION:
        return permute_nchw_to_nhwc(x)
    # TODO(synk): arbitrary permutations other than (0,2,3,1) fall back to XLA transpose.
    return jnp.transpose(x, permutation)


if __name__ == "__main__":
    key = jax.random.PRNGKey(0)
    k_small, k_med, k_bf16 = jax.random.split(key, 3)

    # Small NCHW input: batch=2, channels=4, spatial=16x16 (force the kernel path).
    x_small = jax.random.normal(k_small, (2, 4, 16, 16), dtype=jnp.float32)
    out_small = jax.block_until_ready(permute_nchw_to_nhwc(x_small, force_kernel=True))
    ref_small = jnp.transpose(x_small, PERMUTATION)
    assert out_small.shape == ref_small.shape, (out_small.shape, ref_small.shape)
    assert out_small.dtype == ref_small.dtype
    assert jnp.array_equal(out_small, ref_small), "Pallas permute mismatch (small)"

    # Unaligned medium shape: C=200, H*W=576 exercise ragged edge blocks (no padding).
    x_med = jax.random.normal(k_med, (2, 200, 24, 24), dtype=jnp.float32)
    out_med = jax.block_until_ready(permute_nchw_to_nhwc(x_med, force_kernel=True))
    ref_med = jnp.transpose(x_med, PERMUTATION)
    assert jnp.array_equal(out_med, ref_med), "Pallas permute mismatch (medium/unaligned)"

    # Narrow dtype + unaligned spatial extent (bf16, packed sublanes, ragged edge).
    x_bf16 = jax.random.normal(k_bf16, (1, 96, 20, 20), dtype=jnp.float32).astype(jnp.bfloat16)
    out_bf16 = jax.block_until_ready(permute_nchw_to_nhwc(x_bf16, force_kernel=True))
    ref_bf16 = jnp.transpose(x_bf16, PERMUTATION)
    assert jnp.array_equal(out_bf16, ref_bf16), "Pallas permute mismatch (bf16/unaligned)"

    # Generic module-style entry point (dispatches; tiny shape uses XLA fallback).
    out_gen = jax.block_until_ready(permute(x_small, PERMUTATION))
    assert jnp.array_equal(out_gen, ref_small)

    print("KERNEL_OK")
</pallas_src>

<mosaic_0001>
module attributes {stable_mosaic.version = 11 : i64} {
  func.func @_permute_tile_kernel(%arg0: i32, %arg1: i32, %arg2: i32, %arg3: memref<1x4x128xf32, #tpu.memory_space<vmem>>, %arg4: memref<1x128x4xf32, #tpu.memory_space<vmem>>) attributes {dimension_semantics = [#tpu.dimension_semantics<parallel>, #tpu.dimension_semantics<parallel>, #tpu.dimension_semantics<parallel>], iteration_bounds = array<i64: 2, 2, 1>, scalar_prefetch = 0 : i64, scratch_operands = 0 : i64, tpu.core_type = #tpu.core_type<tc>, window_params = [{transform_indices = @transform_0, window_bounds = array<i64: 1, 4, 128>}, {transform_indices = @transform_1, window_bounds = array<i64: 1, 128, 4>}]} {
    %c0 = arith.constant 0 : index
    %c0_0 = arith.constant 0 : index
    %c0_1 = arith.constant 0 : index
    %0 = vector.load %arg3[%c0, %c0_0, %c0_1] : memref<1x4x128xf32, #tpu.memory_space<vmem>>, vector<1x4x128xf32>
    %1 = vector.shape_cast %0 : vector<1x4x128xf32> to vector<4x128xf32>
    %2 = tpu.transpose %1, [1, 0] : vector<4x128xf32> -> vector<128x4xf32>
    %c0_2 = arith.constant 0 : index
    %c0_3 = arith.constant 0 : index
    %c0_4 = arith.constant 0 : index
    %3 = vector.load %arg4[%c0_2, %c0_3, %c0_4] : memref<1x128x4xf32, #tpu.memory_space<vmem>>, vector<1x128x4xf32>
    %4 = vector.shape_cast %3 : vector<1x128x4xf32> to vector<128x4xf32>
    %5 = vector.shape_cast %2 : vector<128x4xf32> to vector<1x128x4xf32>
    tpu.vector_store %arg4[%c0_2, %c0_3, %c0_4], %5 {strides = array<i32>} : memref<1x128x4xf32, #tpu.memory_space<vmem>>, vector<1x128x4xf32>,
    return
  }
  func.func @transform_0(%arg0: i32, %arg1: i32, %arg2: i32) -> (i32, i32, i32) {
    %c0_i32 = arith.constant 0 : i32
    return %arg0, %arg2, %arg1 : i32, i32, i32
  }
  func.func @transform_1(%arg0: i32, %arg1: i32, %arg2: i32) -> (i32, i32, i32) {
    %c0_i32 = arith.constant 0 : i32
    return %arg0, %arg1, %arg2 : i32, i32, i32
  }
}

</mosaic_0001>

<bundles_post_ra>
// kernel: tpu_custom_call.1
= control target key start
LH: loop header
LB: loop body
LE: loop exit
PB: predicated region body
PF: predicated region fallthrough
CT: control target
= control target key end

     0   :  { %6 = vsyncpa [#allocation3], 0  ;;  %s686_s0 = inlined_call_operand.hbm [shape: f32[2,4,256], index: 0, kind: input, shape index: {}]   ;;  %s687_s1 = inlined_call_operand.vmem [shape: f32[2,256,4], index: 1, kind: output, shape index: {}]  }
   0x1   :  { %8 = vsyncpa [#allocation3 + $0x1], 0  ;;  %s538_s6 = smov 0   ;;  %s540_s7 = smov 0  }
   0x2   :  { %s542_s8 = smov 0   ;;  %s544_s9 = smov 0  }
   0x3   :  { %s546_s10 = smov 0   ;;  %s548_s11 = smov 0  }
   0x4   :  { %s550_s12 = smov 0   ;;  %s552_s13 = smov 0  }
   0x5 LB: > { %s344_s14 = sadd.s32 4294967295, %s526_s13   ;;  %s29_s15 = sadd.s32 1, %s518_s11  ;;  %s526_s13 = sphi %s552_s13, %s14_s13   ;;  %s522_s12 = sphi %s550_s12, %s696_s12   ;;  %s518_s11 = sphi %s548_s11, %s695_s11   ;;  %s514_s10 = sphi %s546_s10, %s694_s10   ;;  %s510_s9 = sphi %s544_s9, %s693_s9   ;;  %s506_s8 = sphi %s542_s8, %s692_s8   ;;  %s502_s7 = sphi %s540_s7, %s691_s7   ;;  %s498_s6 = sphi %s538_s6, %s690_s6  }
   0x6   : > { %p31_p0 = scmp.ge.s32.totalorder %s29_s15, 2  ;;  %s33_s16 = sadd.s32 1, %s522_s12 }
   0x7   : > { %s44_s17 = sadd.s32 1, %s506_s8  ;;  %p51_p1 = scmp.ne.s32.totalorder %s506_s8, %s502_s7 }
   0x8   : > { %s698_s15 = smov (%p31_p0, %s29_s15), 0  ;;  %s700_s16 = smov (!%p31_p0, %s33_s16), %s522_s12 }
   0x9   : > { %s40_s18 = ssub.s32 %s518_s11, %s698_s15  ;;  %p52_p2 = scmp.eq.s32.totalorder %s526_s13, 0 }
   0xa   : > { %p35_p3 = scmp.ge.s32.totalorder %s700_s16, 2  ;;  %p57_p4 = scmp.ne.s32.totalorder %s502_s7, %s498_s6 }
   0xb   : > { %p589_p5 = por %p52_p2, %p51_p1  ;;  %p58_p6 = scmp.eq.s32.totalorder %s344_s14, 0 }
   0xc   : > { %s702_s16 = smov (%p35_p3, %s700_s16), 0  ;;  %p364_p8 = scmp.lt.s32.totalorder %s526_s13, 4 }
   0xd   : > { %p595_p7 = por %p58_p6, %p57_p4  ;;  %s37_s21 = ssub.s32 %s522_s12, %s702_s16 }
   0xe   : > { %s41_s22 = sor.u32 %s40_s18, %s37_s21  ;;  %s111_s23 = sand.u32 1, %s506_s8  }
   0xf   : > { %p42_p9 = scmp.eq.s32.totalorder %s41_s22, 0  ;;  %s348_s24 = sshll.u32 %s111_s23, 2 }
  0x10   : > { %s349_s25 = sshll.u32 %s522_s12, 1  ;;  %s115_s29 = scalar_lea.vmem [#allocation2], %s348_s24 }
  0x11   : > { %s605_s26 = scalar_select %p42_p9, %s506_s8, %s44_s17  }
  0x12   : > { %s121_s27 = sadd.s32 %s518_s11, %s349_s25  ;;  %s127_s30 = sshll.u32 %s115_s29, 4  ;;  %s128_s30 = int_to_ptr.vmem [resolvable:$true] %s127_s30 }
  0x13   : > { %s350_s28 = sshll.u32 %s121_s27, 2  ;;  %p361_p10 = pnand %p364_p8, %p589_p5 }
  0x14   : > { %s123_s4 = scalar_lea.hbm %s686_s0, %s350_s28  ;;  %p351_p11 = scmp.ge.s32.totalorder %s526_s13, 1 }
  0x15   : > { %s125_s5 = sshll.u32 %s123_s4, 4  ;;  %p132_p12 = scmp.lt.s32.totalorder %s526_s13, 5  ;;  %s126_s5 = int_to_ptr.hbm [resolvable:$true] %s125_s5 }
  0x16   : > { %s112_s6 = scalar_lea.sflag [#allocation3], %s111_s23 }
  0x17   : > { %363 = dma.hbm_to_vmem [thread:$0]  (!%p361_p10), %s126_s5, 64, %s128_s30, %s112_s6  }
  0x18   : > { %p133_p13 = pnand %p351_p11, %p132_p12 }
  0x19   : > { %s138_s14 = sand.u32 (!%p133_p13), 1, %s502_s7  }
  0x1a   : > { %136 = sbr.rel (%p133_p13) target bundleno = 319 (0x13f), region = 24  ;;  %s352_s17 = sshll.u32 (!%p133_p13), %s138_s14, 2 }
  0x1b   : > { %s139_s18 = scalar_lea.sflag (!%p133_p13), [#allocation3], %s138_s14  ;;  %s142_s21 = scalar_lea.vmem (!%p133_p13), [#allocation2], %s352_s17 }
  0x1f   : > { %493 = dma.done.wait (%p595_p7), %s139_s18, 64  }
  0x20   : > { %495 = vsyncadd (%p595_p7), %s139_s18, 4294967232  ;;  %v182_v0 = vld [vmem:[%s142_s21] sm:$0xf]  ;;  %s353_s19 = sshll.u32 %s510_s9, 4  ;;  %p170_p0 = scmp.lt.s32.totalorder %s514_s10, 1  ;;  %vm215_vm0 = vcmask 31744  }
  0x21   : > { %183 = vxpose.xlu0.b32.start.end [1/1] (short) %v182_v0, 128  ;;  %p172_p1 = scmp.lt.s32.totalorder %s353_s19, 31 }
  0x22   : > { %s704_s10 = smov (!%p170_p0, %s514_s10), 1 }
  0x23   : > { %s706_s19 = smov (!%p172_p1, %s353_s19), 31  ;;  %s354_s22 = sshll.u32 %s704_s10, 5 }
  0x24   : > { %s178_s23 = sadd.s32 %s354_s22, %s706_s19 }
  0x25   : > { %s355_s24 = sshll.u32 %s178_s23, 3 }
  0x26   : > { %s628_s28 = scalar_lea.vmem %s687_s1, %s355_s24 }
  0xc5   : > { %v199_v1 = vpop.trf.xlu0 }
  0xc6   : > { %216 = vst.msk [vmem:[%s628_s28] sm:$0xff] %vm215_vm0, %v199_v1 }
  0xcd   : > { %v200_v2 = vpop.trf.xlu0 }
  0xce   : > { %217 = vst.msk [vmem:[%s628_s28 + $0x8] sm:$0xff] %vm215_vm0, %v200_v2 }
  0xd5   : > { %v201_v3 = vpop.trf.xlu0 }
  0xd6   : > { %218 = vst.msk [vmem:[%s628_s28 + $0x10] sm:$0xff] %vm215_vm0, %v201_v3 }
  0xdd   : > { %v202_v4 = vpop.trf.xlu0 }
  0xde   : > { %219 = vst.msk [vmem:[%s628_s28 + $0x18] sm:$0xff] %vm215_vm0, %v202_v4 }
  0xe5   : > { %v203_v5 = vpop.trf.xlu0 }
  0xe6   : > { %220 = vst.msk [vmem:[%s628_s28 + $0x20] sm:$0xff] %vm215_vm0, %v203_v5 }
  0xed   : > { %v204_v6 = vpop.trf.xlu0 }
  0xee   : > { %221 = vst.msk [vmem:[%s628_s28 + $0x28] sm:$0xff] %vm215_vm0, %v204_v6 }
  0xf5   : > { %v205_v7 = vpop.trf.xlu0 }
  0xf6   : > { %222 = vst.msk [vmem:[%s628_s28 + $0x30] sm:$0xff] %vm215_vm0, %v205_v7 }
  0xfd   : > { %v206_v8 = vpop.trf.xlu0 }
  0xfe   : > { %223 = vst.msk [vmem:[%s628_s28 + $0x38] sm:$0xff] %vm215_vm0, %v206_v8 }
 0x105   : > { %v207_v9 = vpop.trf.xlu0 }
 0x106   : > { %224 = vst.msk [vmem:[%s628_s28 + $0x40] sm:$0xff] %vm215_vm0, %v207_v9 }
 0x10d   : > { %v208_v10 = vpop.trf.xlu0 }
 0x10e   : > { %225 = vst.msk [vmem:[%s628_s28 + $0x48] sm:$0xff] %vm215_vm0, %v208_v10 }
 0x115   : > { %v209_v11 = vpop.trf.xlu0 }
 0x116   : > { %226 = vst.msk [vmem:[%s628_s28 + $0x50] sm:$0xff] %vm215_vm0, %v209_v11 }
 0x11d   : > { %v210_v12 = vpop.trf.xlu0 }
 0x11e   : > { %227 = vst.msk [vmem:[%s628_s28 + $0x58] sm:$0xff] %vm215_vm0, %v210_v12 }
 0x125   : > { %v211_v13 = vpop.trf.xlu0 }
 0x126   : > { %228 = vst.msk [vmem:[%s628_s28 + $0x60] sm:$0xff] %vm215_vm0, %v211_v13 }
 0x12d   : > { %v212_v14 = vpop.trf.xlu0 }
 0x12e   : > { %229 = vst.msk [vmem:[%s628_s28 + $0x68] sm:$0xff] %vm215_vm0, %v212_v14 }
 0x135   : > { %v213_v15 = vpop.trf.xlu0 }
 0x136   : > { %230 = vst.msk [vmem:[%s628_s28 + $0x70] sm:$0xff] %vm215_vm0, %v213_v15 }
 0x13d   : > { %v214_v16 = vpop.trf.xlu0 }
 0x13e   : > { %231 = vst.msk [vmem:[%s628_s28 + $0x78] sm:$0xff] %vm215_vm0, %v214_v16 }
 0x13f PF: > { %s14_s13 = sadd.s32 1, %s526_s13   ;;  %s690_s6 = smov %s502_s7 }
 0x140   : > { %p11_p2 = scmp.ge.s32.totalorder %s14_s13, 6   ;;  %s691_s7 = smov %s506_s8 }
 0x141   : > { %s692_s8 = smov %s605_s26  ;;  %s693_s9 = smov %s518_s11 }
 0x142   : > { %s694_s10 = smov %s522_s12  ;;  %s695_s11 = smov %s698_s15 }
 0x143   : > { %s696_s12 = smov %s702_s16  ;;  %13 = sbr.rel (!%p11_p2) target bundleno = 5 (0x5), region = 64 }
 0x148   :  { %268 = vsyncpa [#allocation3], 1 }
 0x149   :  { %270 = vsyncpa [#allocation3 + $0x1], 1 }

</bundles_post_ra>
